<compile_context>
chip_gen: v7x
topology: tpu7x:2x2x1
jax: 0.10.0
libtpu: 0.0.40
codegen_flags: <defaults>
</compile_context>

<pallas_src>
import functools

import jax
import jax.numpy as jnp
from jax import lax
from jax.experimental import pallas as pl
from jax.experimental.pallas import tpu as pltpu


def _round_up(n: int, m: int) -> int:
    return ((n + m - 1) // m) * m


def _vmem_capacity_bytes() -> int:
    """Physical VMEM per TensorCore; conservative (v7x-sized) fallback."""
    try:
        return int(getattr(pltpu.get_tpu_info(), "vmem_capacity_bytes", 64 << 20))
    except Exception:  # pragma: no cover - query unavailable (e.g. interpret)
        return 64 << 20


def _pick_tile(batch: int, block_m) -> tuple[int, int, int]:
    """Pick (tm, num_tiles, vmem_limit_bytes) for this generation/batch."""
    phys = _vmem_capacity_bytes()
    if phys >= (100 << 20):
        # v5e / v6e: 128 MiB physical VMEM -> 32K-row tiles, 64 MiB scoped.
        gen_cap, vmem_limit = 32768, 64 << 20
    else:
        # v7x: only 64 MiB physical per TensorCore -> cap at 16K rows and
        # leave headroom (a v6e-sized 32K tile does not fit comfortably).
        gen_cap, vmem_limit = 16384, 48 << 20

    cap = gen_cap if block_m is None else max(128, min(gen_cap, _round_up(block_m, 128)))

    # >= 2 tiles whenever the batch allows it (v7x megacore); tm is always a
    # multiple of 128 so the (1, tm) output row stays an unmasked store.
    tm = min(cap, _round_up(max(-(-batch // 2), 1), 128))
    tm = max(tm, 128)
    num_tiles = -(-batch // tm)
    return tm, num_tiles, vmem_limit


def _mlp_kernel(x_ref, w1t_ref, b1_ref, w2_ref, b2_ref, o_ref):
    # x_ref:   (tm, D)    current batch tile (rows on sublanes, features on lanes)
    # w1t_ref: (H, D)     transposed layer-1 weight, resident
    # b1_ref:  (H, 1)     layer-1 bias column, resident
    # w2_ref:  (1, H)     layer-2 weight row, resident
    # b2_ref:  (1, 1)     layer-2 bias, SMEM scalar
    # o_ref:   (1, 1, tm) lane-dense output row for this tile
    #
    # Layer 1 (MXU): NT contraction over the feature dim of both operands
    # (same form as flash attention's q @ k.T), hidden comes out as (H, tm)
    # with batch on lanes — no XLU relayout of the streamed x tile.
    h = lax.dot_general(
        w1t_ref[...], x_ref[...],
        dimension_numbers=(((1,), (1,)), ((), ())),
        preferred_element_type=jnp.float32,
    )
    h = jnp.maximum(h + b1_ref[...], 0.0)                    # bias + ReLU (VPU)

    # Layer 2 (N = 1) on the MXU as well: (1, H) x (H, tm) -> (1, tm).
    y = lax.dot_general(
        w2_ref[...], h,
        dimension_numbers=(((1,), (0,)), ((), ())),
        preferred_element_type=jnp.float32,
    )
    y = y + b2_ref[0, 0]                                     # SMEM scalar bias
    o_ref[...] = y.reshape(o_ref.shape).astype(o_ref.dtype)


@functools.partial(jax.jit, static_argnames=("block_m",))
def price_predictor_forward(x, w1, b1, w2, b2, *, block_m=None):
    """Forward pass of PricePredictorNN.

    x:  (batch, input_dim) float32
    w1: (input_dim, hidden_dim), b1: (hidden_dim,)
    w2: (hidden_dim, 1),         b2: (1,)
    returns (batch, 1) float32

    block_m optionally caps the batch-tile size; by default the tile is
    generation-sized (32K rows on v5e/v6e, 16K on v7x).
    """
    batch, input_dim = x.shape
    hidden_dim = w1.shape[1]
    tm, num_tiles, vmem_limit = _pick_tile(batch, block_m)

    # Tiny weight-side layout plumbing, done once in XLA.
    w1t = w1.T                                # (H, D)
    b1_col = b1.reshape(hidden_dim, 1)        # (H, 1)
    w2_row = w2.reshape(1, hidden_dim)        # (1, H)  (column -> row, same data)
    b2_2d = b2.reshape(1, 1)                  # (1, 1) -> SMEM

    out_tiles = pl.pallas_call(
        _mlp_kernel,
        out_shape=jax.ShapeDtypeStruct((num_tiles, 1, tm), x.dtype),
        grid_spec=pltpu.PrefetchScalarGridSpec(
            num_scalar_prefetch=0,
            grid=(num_tiles,),
            in_specs=[
                pl.BlockSpec((tm, input_dim), lambda i: (i, 0)),           # x tile (streamed)
                pl.BlockSpec((hidden_dim, input_dim), lambda i: (0, 0)),   # w1.T (resident)
                pl.BlockSpec((hidden_dim, 1), lambda i: (0, 0)),           # b1   (resident)
                pl.BlockSpec((1, hidden_dim), lambda i: (0, 0)),           # w2   (resident)
                pl.BlockSpec(memory_space=pltpu.MemorySpace.SMEM),         # b2 scalar
            ],
            out_specs=pl.BlockSpec((1, 1, tm), lambda i: (i, 0, 0)),       # lane-dense row
        ),
        compiler_params=pltpu.CompilerParams(
            # Batch tiles are independent: "parallel" lets v7x shard them
            # across both TensorCores; neutral on single-TC v5e/v6e.
            dimension_semantics=("parallel",),
            vmem_limit_bytes=vmem_limit,
        ),
    )(x, w1t, b1_col, w2_row, b2_2d)

    # Lane-dense (num_tiles, 1, tm) slab -> (batch, 1); crops the garbage
    # produced by the padded rows of the final partial tile.
    return out_tiles.reshape(-1)[:batch].reshape(batch, 1)


def init_params(key, input_dim, hidden_dim=64):
    """Deterministic parameter init mimicking nn.Linear's uniform init."""
    k1, k2, k3, k4 = jax.random.split(key, 4)
    bound1 = 1.0 / jnp.sqrt(input_dim)
    bound2 = 1.0 / jnp.sqrt(hidden_dim)
    w1 = jax.random.uniform(k1, (input_dim, hidden_dim), jnp.float32, -bound1, bound1)
    b1 = jax.random.uniform(k2, (hidden_dim,), jnp.float32, -bound1, bound1)
    w2 = jax.random.uniform(k3, (hidden_dim, 1), jnp.float32, -bound2, bound2)
    b2 = jax.random.uniform(k4, (1,), jnp.float32, -bound2, bound2)
    return w1, b1, w2, b2


def _reference(x, w1, b1, w2, b2):
    return jnp.maximum(x @ w1 + b1[None, :], 0.0) @ w2 + b2[None, :]


if __name__ == "__main__":
    key = jax.random.PRNGKey(0)
    kx, kp, kx2 = jax.random.split(key, 3)

    input_dim = 16
    hidden_dim = 64      # module default
    w1, b1, w2, b2 = init_params(kp, input_dim, hidden_dim)

    # Case 1: batch divisible by 128 -> two full 128-row tiles (grid=(2,)).
    batch = 256
    x = jax.random.normal(kx, (batch, input_dim), jnp.float32)
    out = jax.block_until_ready(price_predictor_forward(x, w1, b1, w2, b2))
    ref = _reference(x, w1, b1, w2, b2)
    assert out.shape == (batch, 1)
    assert jnp.allclose(out, ref, atol=1e-4, rtol=1e-4)

    # Case 2: ragged batch -> exercises the padded final tile + crop path.
    batch2 = 1000
    x2 = jax.random.normal(kx2, (batch2, input_dim), jnp.float32)
    out2 = jax.block_until_ready(price_predictor_forward(x2, w1, b1, w2, b2))
    ref2 = _reference(x2, w1, b1, w2, b2)
    assert out2.shape == (batch2, 1)
    assert jnp.allclose(out2, ref2, atol=1e-4, rtol=1e-4)

    print("KERNEL_OK")
</pallas_src>

<mosaic_0001>
module attributes {stable_mosaic.version = 11 : i64} {
  func.func @_mlp_kernel(%arg0: i32, %arg1: memref<128x16xf32, #tpu.memory_space<vmem>>, %arg2: memref<64x16xf32, #tpu.memory_space<vmem>>, %arg3: memref<64x1xf32, #tpu.memory_space<vmem>>, %arg4: memref<1x64xf32, #tpu.memory_space<vmem>>, %arg5: memref<1x1xf32, #tpu.memory_space<smem>>, %arg6: memref<1x1x128xf32, #tpu.memory_space<vmem>>) attributes {dimension_semantics = [#tpu.dimension_semantics<parallel>], iteration_bounds = array<i64: 2>, scalar_prefetch = 0 : i64, scratch_operands = 0 : i64, tpu.core_type = #tpu.core_type<tc>, window_params = [{transform_indices = @transform_0, window_bounds = array<i64: 128, 16>}, {pipeline_mode = #tpu.pipeline_mode<synchronous>, transform_indices = @transform_1, window_bounds = array<i64: 64, 16>}, {pipeline_mode = #tpu.pipeline_mode<synchronous>, transform_indices = @transform_2, window_bounds = array<i64: 64, 1>}, {pipeline_mode = #tpu.pipeline_mode<synchronous>, transform_indices = @transform_3, window_bounds = array<i64: 1, 64>}, {transform_indices = @transform_4, window_bounds = array<i64: 1, 1>}, {transform_indices = @transform_5, window_bounds = array<i64: 1, 1, 128>}]} {
    %c0 = arith.constant 0 : index
    %c0_0 = arith.constant 0 : index
    %0 = vector.load %arg2[%c0, %c0_0] : memref<64x16xf32, #tpu.memory_space<vmem>>, vector<64x16xf32>
    %c0_1 = arith.constant 0 : index
    %c0_2 = arith.constant 0 : index
    %1 = vector.load %arg1[%c0_1, %c0_2] : memref<128x16xf32, #tpu.memory_space<vmem>>, vector<128x16xf32>
    %cst = arith.constant dense<0.000000e+00> : vector<64x128xf32>
    %2 = tpu.matmul %0, %1, %cst {dimension_numbers = #tpu.dot_dimension_numbers<[1], [1], [0], [0], [0, 0, 1, 0], [], []>} : vector<64x16xf32>, vector<128x16xf32>, vector<64x128xf32> -> vector<64x128xf32>
    %c0_3 = arith.constant 0 : index
    %c0_4 = arith.constant 0 : index
    %3 = vector.load %arg3[%c0_3, %c0_4] : memref<64x1xf32, #tpu.memory_space<vmem>>, vector<64x1xf32>
    %4 = vector.broadcast %3 : vector<64x1xf32> to vector<64x128xf32>
    %5 = arith.addf %2, %4 : vector<64x128xf32>
    %cst_5 = arith.constant 0.000000e+00 : f32
    %6 = vector.broadcast %cst_5 : f32 to vector<64x128xf32>
    %7 = arith.maximumf %5, %6 : vector<64x128xf32>
    %c0_6 = arith.constant 0 : index
    %c0_7 = arith.constant 0 : index
    %8 = vector.load %arg4[%c0_6, %c0_7] : memref<1x64xf32, #tpu.memory_space<vmem>>, vector<1x64xf32>
    %cst_8 = arith.constant dense<0.000000e+00> : vector<1x128xf32>
    %9 = tpu.matmul %8, %7, %cst_8 {dimension_numbers = #tpu.dot_dimension_numbers<[1], [0], [0], [1], [0, 0, 1, 1], [], []>} : vector<1x64xf32>, vector<64x128xf32>, vector<1x128xf32> -> vector<1x128xf32>
    %c0_9 = arith.constant 0 : index
    %c0_10 = arith.constant 0 : index
    %10 = memref.load %arg5[%c0_9, %c0_10] : memref<1x1xf32, #tpu.memory_space<smem>>
    %11 = vector.broadcast %10 : f32 to vector<1x128xf32>
    %12 = arith.addf %9, %11 : vector<1x128xf32>
    %13 = vector.shape_cast %12 : vector<1x128xf32> to vector<1x1x128xf32>
    %c0_11 = arith.constant 0 : index
    %c0_12 = arith.constant 0 : index
    %c0_13 = arith.constant 0 : index
    %14 = vector.load %arg6[%c0_11, %c0_12, %c0_13] : memref<1x1x128xf32, #tpu.memory_space<vmem>>, vector<1x1x128xf32>
    tpu.vector_store %arg6[%c0_11, %c0_12, %c0_13], %13 {strides = array<i32>} : memref<1x1x128xf32, #tpu.memory_space<vmem>>, vector<1x1x128xf32>,
    return
  }
  func.func @transform_0(%arg0: i32) -> (i32, i32) {
    %c0_i32 = arith.constant 0 : i32
    %c0_i32_0 = arith.constant 0 : i32
    return %arg0, %c0_i32 : i32, i32
  }
  func.func @transform_1(%arg0: i32) -> (i32, i32) {
    %c0_i32 = arith.constant 0 : i32
    %c0_i32_0 = arith.constant 0 : i32
    %c0_i32_1 = arith.constant 0 : i32
    return %c0_i32, %c0_i32_0 : i32, i32
  }
  func.func @transform_2(%arg0: i32) -> (i32, i32) {
    %c0_i32 = arith.constant 0 : i32
    %c0_i32_0 = arith.constant 0 : i32
    %c0_i32_1 = arith.constant 0 : i32
    return %c0_i32, %c0_i32_0 : i32, i32
  }
  func.func @transform_3(%arg0: i32) -> (i32, i32) {
    %c0_i32 = arith.constant 0 : i32
    %c0_i32_0 = arith.constant 0 : i32
    %c0_i32_1 = arith.constant 0 : i32
    return %c0_i32, %c0_i32_0 : i32, i32
  }
  func.func @transform_4(%arg0: i32) -> (i32, i32) {
    %c0_i32 = arith.constant 0 : i32
    %c0_i32_0 = arith.constant 0 : i32
    %c0_i32_1 = arith.constant 0 : i32
    return %c0_i32, %c0_i32_0 : i32, i32
  }
  func.func @transform_5(%arg0: i32) -> (i32, i32, i32) {
    %c0_i32 = arith.constant 0 : i32
    %c0_i32_0 = arith.constant 0 : i32
    %c0_i32_1 = arith.constant 0 : i32
    return %arg0, %c0_i32, %c0_i32_0 : i32, i32, i32
  }
}

</mosaic_0001>

<bundles_post_ra>
// kernel: price_predictor_forward.1
= control target key start
LH: loop header
LB: loop body
LE: loop exit
PB: predicated region body
PF: predicated region fallthrough
CT: control target
= control target key end

     0   :  { %s1180_s0 = inlined_call_operand.vmem [shape: f32[256,16], index: 0, kind: input, shape index: {}]   ;;  %s1181_s1 = inlined_call_operand.vmem [shape: f32[64,16], index: 1, kind: input, shape index: {}]   ;;  %s1182_s2 = inlined_call_operand.vmem [shape: f32[64,1], index: 2, kind: input, shape index: {}]   ;;  %s1183_s3 = inlined_call_operand.vmem [shape: f32[1,64], index: 3, kind: input, shape index: {}]   ;;  %s1184_s4 = inlined_call_operand.<no memory space> [shape: f32[1,1], index: 4, kind: input, shape index: {}]   ;;  %s1185_s5 = inlined_call_operand.hbm [shape: f32[2,1,128], index: 5, kind: output, shape index: {}]  }
   0x1   :  { %10 = sst [smem:[#allocation2]] %s1184_s4 }
   0x2   :  { %11 = vsyncpa [#allocation4], 0 }
   0x3   :  { %13 = vsyncpa [#allocation4 + $0x1], 0  ;;  %s966_s20 = smov 0   ;;  %s968_s21 = smov 0  }
   0x4   :  { %s970_s22 = smov 0   ;;  %s972_s23 = smov 0  }
   0x5 LB: > { %s628_s4 = sadd.s32 4294967295, %s926_s23   ;;  %s629_s24 = sadd.s32 4294967294, %s926_s23   ;;  %s926_s23 = sphi %s972_s23, %s1193_s23   ;;  %s922_s22 = sphi %s970_s22, %s1192_s22   ;;  %s918_s21 = sphi %s968_s21, %s1191_s21   ;;  %s914_s20 = sphi %s966_s20, %s1190_s20  }
   0x6   : > { %s989_s25 = sadd.s32 1, %s926_s23   ;;  %s136_s26 = sadd.s32 1, %s922_s22 }
   0x7   : > { %s133_s27 = ssub.s32 %s926_s23, %s989_s25  ;;  %p146_p0 = scmp.ne.s32.totalorder %s922_s22, %s918_s21 }
   0x8   : > { %p134_p1 = scmp.eq.s32.totalorder %s133_s27, 0  ;;  %p147_p2 = scmp.eq.s32.totalorder %s628_s4, 1 }
   0x9   : > { %p152_p3 = scmp.ne.s32.totalorder %s918_s21, %s914_s20  ;;  %p153_p4 = scmp.eq.s32.totalorder %s629_s24, 1 }
   0xa   : > { %s999_s28 = scalar_select %p134_p1, %s922_s22, %s136_s26  }
   0xb   : > { %p1001_p5 = por %p147_p2, %p146_p0  ;;  %p1005_p6 = por %p153_p4, %p152_p3 }
   0xc   : > { %p632_p7 = scmp.ge.s32.totalorder %s926_s23, 1  ;;  %p192_p8 = scmp.lt.s32.totalorder %s926_s23, 3 }
   0xe   : > { %p193_p9 = pnand %p632_p7, %p192_p8 }
   0xf   : > { %s1011_s6 = sshll.u32 (!%p193_p9), %s628_s4, 4  ;;  %vm297_vm0 = vcmask (!%p193_p9), 130048   ;;  %v225_v0 = vld [vmem:[%s1181_s1] sm:$0xff] (!%p193_p9)  ;;  %v928_v1 = vmov (!%p193_p9), 0   ;;  %v251_v3 = vld [vmem:[%s1182_s2 + $0x10] sm:$0xff] (!%p193_p9)  ;;  %v250_v4 = vld [vmem:[%s1182_s2 + $0x8] sm:$0xff] (!%p193_p9) }
  0x10   : > { %196 = sbr.rel (%p193_p9) target bundleno = 556 (0x22c), region = 40  ;;  %p220_p10 = scmp.lt.s32.totalorder (!%p193_p9), %s1011_s6, 31  ;;  %728 = vmatprep.mubr.msk.f32.mxu0 (!%p193_p9), %vm297_vm0, %v225_v0  ;;  %862 = vset.pattern.permute.xlu0 (!%p193_p9), %v928_v1  ;;  %v249_v2 = vld [vmem:[%s1182_s2] sm:$0xff] (!%p193_p9)  ;;  %v252_v5 = vld [vmem:[%s1182_s2 + $0x18] sm:$0xff] (!%p193_p9)  ;;  %vm1038_vm1 = vmpackc.low (!%p193_p9), %vm297_vm0, %vm297_vm0  ;;  %v929_v42 = vmov (!%p193_p9), 0.0|0.0   ;;  %vm930_vm2 = vmmov (!%p193_p9), 0  }
  0x11   : > { %863 = vset.pattern.permute.xlu1 (!%p193_p9), %v928_v1  ;;  %259 = vperm.xlu0 (!%p193_p9), %862, %v249_v2   ;;  %v253_v13 = vld [vmem:[%s1182_s2 + $0x20] sm:$0xff] (!%p193_p9)  ;;  %v254_v14 = vld [vmem:[%s1182_s2 + $0x28] sm:$0xff] (!%p193_p9)  ;;  %v255_v17 = vld [vmem:[%s1182_s2 + $0x30] sm:$0xff] (!%p193_p9)  ;;  %v931_v43 = vmov (!%p193_p9), 0.0   ;;  %vm486_vm3 = vcmask (!%p193_p9), 523264   ;;  %s484_s12 = sld [smem:[#allocation2]] (!%p193_p9)  ;;  %s1138_s18 = scalar_lea.hbm (!%p193_p9), %s1185_s5, %s1011_s6 }
  0x12   : > { %269 = vperm.xlu1 (!%p193_p9), %863, %v251_v3   ;;  %v256_v18 = vld [vmem:[%s1182_s2 + $0x38] sm:$0xff] (!%p193_p9)  ;;  %v226_v35 = vld [vmem:[%s1181_s1 + $0x8] sm:$0xff] (!%p193_p9)  ;;  %v227_v36 = vld [vmem:[%s1181_s1 + $0x10] sm:$0xff] (!%p193_p9)  ;;  %807 = vmatprep.subr.bf16.mxu1 (!%p193_p9), %v929_v42  ;;  %s217_s13 = sand.u32 (!%p193_p9), 1, %s918_s21  }
  0x13   : > { %v228_v37 = vld [vmem:[%s1181_s1 + $0x18] sm:$0xff] (!%p193_p9)  ;;  %v229_v38 = vld [vmem:[%s1181_s1 + $0x20] sm:$0xff] (!%p193_p9)  ;;  %v230_v39 = vld [vmem:[%s1181_s1 + $0x28] sm:$0xff] (!%p193_p9)  ;;  %756 = vmatprep.mubr.msk.f32.mxu1 (!%p193_p9), %vm930_vm2, %v931_v43  ;;  %s562_s19 = scalar_lea.sflag (!%p193_p9), [#allocation4], %s217_s13 }
  0x14   : > { %v231_v40 = vld [vmem:[%s1181_s1 + $0x30] sm:$0xff] (!%p193_p9)  ;;  %v232_v41 = vld [vmem:[%s1181_s1 + $0x38] sm:$0xff] (!%p193_p9) }
  0x15   : > { %264 = vperm.xlu0 (!%p193_p9), %862, %v250_v4  }
  0x16   : > { %274 = vperm.xlu1 (!%p193_p9), %863, %v252_v5  }
  0x17   : > { %s221_s9 = scalar_select %p220_p10, %s1011_s6, 31 }
  0x19   : > { %s634_s14 = sshll.u32 %s221_s9, 3  ;;  %279 = vperm.xlu0 %862, %v253_v13  }
  0x1a   : > { %s1034_s24 = scalar_lea.vmem %s1180_s0, %s634_s14  ;;  %284 = vperm.xlu1 %863, %v254_v14   ;;  %s218_s14 = scalar_lea.vmem [#allocation3], %s217_s13 }
  0x1b   : > { %v233_v7 = vld [vmem:[%s1034_s24] sm:$0xff]  ;;  %v234_v8 = vld [vmem:[%s1034_s24 + $0x8] sm:$0xff]  ;;  %v235_v9 = vld [vmem:[%s1034_s24 + $0x10] sm:$0xff]  ;;  %s574_s15 = sshll.u32 %s218_s14, 4  ;;  %s1140_s15 = int_to_ptr.vmem [resolvable:$true] %s574_s15 }
  0x1c   : > { %v759_v10 = vpack.c.bf16 %v234_v8, %v233_v7  ;;  %v236_v11 = vld [vmem:[%s1034_s24 + $0x18] sm:$0xff]  ;;  %v237_v15 = vld [vmem:[%s1034_s24 + $0x20] sm:$0xff]  ;;  %v238_v16 = vld [vmem:[%s1034_s24 + $0x28] sm:$0xff]  ;;  %s864_s4 = scalar_lea.vmem %s1140_s15, 16 }
  0x1d   : > { %v765_v12 = vpack.c.bf16 %v236_v11, %v235_v9  ;;  %v771_v19 = vpack.c.bf16 %v238_v16, %v237_v15  ;;  %289 = vperm.xlu0 %862, %v255_v17   ;;  %v239_v20 = vld [vmem:[%s1034_s24 + $0x30] sm:$0xff]  ;;  %v240_v21 = vld [vmem:[%s1034_s24 + $0x38] sm:$0xff]  ;;  %v241_v23 = vld [vmem:[%s1034_s24 + $0x40] sm:$0xff]  ;;  %v485_v17 = vstv %s484_s12  ;;  %p865_p11 = scmp.ne.s32.totalorder %s1140_s15, %s864_s4 }
  0x1e   : > { %761 = vmatprep.subr.msk.bf16.mxu0 %vm1038_vm1, %v759_v10  ;;  %294 = vperm.xlu1 %863, %v256_v18   ;;  %v777_v22 = vpack.c.bf16 %v240_v21, %v239_v20  ;;  %v242_v24 = vld [vmem:[%s1034_s24 + $0x48] sm:$0xff]  ;;  %v243_v26 = vld [vmem:[%s1034_s24 + $0x50] sm:$0xff]  ;;  %v244_v27 = vld [vmem:[%s1034_s24 + $0x58] sm:$0xff] }
  0x1f   : > { %764 = vmatpush3.bf16.xpose.msk.msra.mxu0 %vm1038_vm1, %v759_v10  ;;  %v783_v25 = vpack.c.bf16 %v242_v24, %v241_v23  ;;  %v789_v28 = vpack.c.bf16 %v244_v27, %v243_v26  ;;  %v245_v29 = vld [vmem:[%s1034_s24 + $0x60] sm:$0xff]  ;;  %v246_v30 = vld [vmem:[%s1034_s24 + $0x68] sm:$0xff]  ;;  %v247_v32 = vld [vmem:[%s1034_s24 + $0x70] sm:$0xff]  ;;  %p866_p12 = pnand %p865_p11, %p1001_p5 }
  0x20   : > { %767 = vmatprep.subr.msk.bf16.mxu0 %vm1038_vm1, %v765_v12  ;;  %v795_v31 = vpack.c.bf16 %v246_v30, %v245_v29  ;;  %v248_v33 = vld [vmem:[%s1034_s24 + $0x78] sm:$0xff]  ;;  %v483_v16 = vld [vmem:[%s1183_s3] sm:$0x1]  ;;  %s932_s24 = smov [#allocation3]  }
  0x21   : > { %v801_v34 = vpack.c.bf16 %v248_v33, %v247_v32  ;;  %p867_p13 = pneg %p866_p12  ;;  %s868_s26 = sshll.u32 %s932_s24, 4  ;;  %s869_s26 = int_to_ptr.vmem [resolvable:$false] %s868_s26 }
  0x22   : > { %s870_s27 = scalar_lea.vmem %s869_s26, 32  ;;  %p871_p0 = scmp.lt.s32.totalorder %s1140_s15, %s869_s26 }
  0x23   : > { %p872_p1 = scmp.lt.s32.totalorder %s870_s27, %s864_s4 }
  0x25   : > { %p873_p2 = por %p872_p1, %p871_p0 }
  0x27   : > { %770 = vmatpush3.bf16.xpose.msk.msra.mxu0 %vm1038_vm1, %v765_v12  ;;  %p874_p3 = pnand %p873_p2, %p867_p13 }
  0x28   : > { %773 = vmatprep.subr.msk.bf16.mxu0 %vm1038_vm1, %v771_v19 }
  0x2f   : > { %776 = vmatpush3.bf16.xpose.msk.msra.mxu0 %vm1038_vm1, %v771_v19 }
  0x30   : > { %779 = vmatprep.subr.msk.bf16.mxu0 %vm1038_vm1, %v777_v22 }
  0x37   : > { %782 = vmatpush3.bf16.xpose.msk.msra.mxu0 %vm1038_vm1, %v777_v22 }
  0x38   : > { %785 = vmatprep.subr.msk.bf16.mxu0 %vm1038_vm1, %v783_v25 }
  0x3f   : > { %788 = vmatpush3.bf16.xpose.msk.msra.mxu0 %vm1038_vm1, %v783_v25 }
  0x40   : > { %791 = vmatprep.subr.msk.bf16.mxu0 %vm1038_vm1, %v789_v28 }
  0x47   : > { %794 = vmatpush3.bf16.xpose.msk.msra.mxu0 %vm1038_vm1, %v789_v28 }
  0x48   : > { %797 = vmatprep.subr.msk.bf16.mxu0 %vm1038_vm1, %v795_v31 }
  0x4f   : > { %800 = vmatpush3.bf16.xpose.msk.msra.mxu0 %vm1038_vm1, %v795_v31 }
  0x50   : > { %803 = vmatprep.subr.msk.bf16.mxu0 %vm1038_vm1, %v801_v34 }
  0x57   : > { %806 = vmatpush3.bf16.xpose.msk.msra.mxu0 %vm1038_vm1, %v801_v34 }
  0x5e   : > { %729 = vmatmul.mubr.msk.f32.vlgmr.msra.gmra.mrb[0].mxu0 %vm297_vm0, %v226_v35 }
  0x5f   : > { %731 = vmatprep.mubr.msk.f32.mxu0 %vm297_vm0, %v227_v36 }
  0x62   : > { %732 = vmatmul.mubr.msk.f32.gmra.mrb[2].mxu0 %vm297_vm0, %v228_v37 }
  0x63   : > { %734 = vmatprep.mubr.msk.f32.mxu0 %vm297_vm0, %v229_v38 }
  0x66   : > { %735 = vmatmul.mubr.msk.f32.gmra.mrb[4].mxu0 %vm297_vm0, %v230_v39 }
  0x67   : > { %737 = vmatprep.mubr.msk.f32.mxu0 %vm297_vm0, %v231_v40 }
  0x6a   : > { %738 = vmatmul.mubr.msk.f32.gmra.mrb[6].mxu0 %vm297_vm0, %v232_v41 }
  0x90   : > { %v260_v44 = vpop.permute.xlu0 %259 }
  0x91   : > { %v270_v45 = vpop.permute.xlu1 %269 }
  0x94   : > { %v265_v46 = vpop.permute.xlu0 %264 }
  0x95   : > { %v275_v47 = vpop.permute.xlu1 %274 }
  0x98   : > { %v280_v60 = vpop.permute.xlu0 %279 }
  0x99   : > { %v285_v57 = vpop.permute.xlu1 %284 }
  0x9c   : > { %v290_v8 = vpop.permute.xlu0 %289 }
  0x9d   : > { %v295_v5 = vpop.permute.xlu1 %294 }
 0x131   : > { %v730_v48 = vpop.f32.mrb[0].mxu0 }
 0x132   : > { %v442_v49 = vadd.f32 %v730_v48, %v265_v46  ;;  %v436_v50 = vpop.f32.mrb[1].mxu0 }
 0x133   : > { %v437_v51 = vadd.f32 %v436_v50, %v260_v44 }
 0x134   : > { %v476_v52 = vmax.f32 %v442_v49, 0.0 }
 0x135   : > { %v475_v53 = vmax.f32 %v437_v51, 0.0  ;;  %v733_v54 = vpop.f32.mrb[2].mxu0 }
 0x136   : > { %v452_v55 = vadd.f32 %v733_v54, %v275_v47  ;;  %v446_v56 = vpop.f32.mrb[3].mxu0 }
 0x137   : > { %v447_v58 = vadd.f32 %v446_v56, %v270_v45  ;;  %v808_v59 = vpack.c.bf16 %v476_v52, %v475_v53 }
 0x138   : > { %v478_v61 = vmax.f32 %v452_v55, 0.0 }
 0x139   : > { %v477_v62 = vmax.f32 %v447_v58, 0.0  ;;  %v736_v63 = vpop.f32.mrb[4].mxu0  ;;  %809 = vmatpush3.bf16.msra.mxu1 %v808_v59 }
 0x13a   : > { %v462_v0 = vadd.f32 %v736_v63, %v285_v57  ;;  %v456_v1 = vpop.f32.mrb[5].mxu0  ;;  %810 = vmatprep.subr.bf16.mxu1 %v929_v42 }
 0x13b   : > { %v811_v2 = vpack.c.bf16 %v478_v61, %v477_v62  ;;  %v457_v3 = vadd.f32 %v456_v1, %v280_v60 }
 0x13c   : > { %v480_v4 = vmax.f32 %v462_v0, 0.0 }
 0x13d   : > { %v479_v6 = vmax.f32 %v457_v3, 0.0  ;;  %v739_v7 = vpop.f32.mrb[6].mxu0  ;;  %812 = vmatpush3.bf16.msra.mxu1 %v811_v2 }
 0x13e   : > { %v472_v9 = vadd.f32 %v739_v7, %v295_v5  ;;  %v466_v10 = vpop.f32.mrb[7].mxu0  ;;  %813 = vmatprep.subr.bf16.mxu1 %v929_v42 }
 0x13f   : > { %v814_v11 = vpack.c.bf16 %v480_v4, %v479_v6  ;;  %v467_v12 = vadd.f32 %v466_v10, %v290_v8 }
 0x140   : > { %v482_v13 = vmax.f32 %v472_v9, 0.0 }
 0x141   : > { %v481_v14 = vmax.f32 %v467_v12, 0.0  ;;  %815 = vmatpush3.bf16.msra.mxu1 %v814_v11 }
 0x142   : > { %816 = vmatprep.subr.bf16.mxu1 %v929_v42 }
 0x143   : > { %v817_v15 = vpack.c.bf16 %v482_v13, %v481_v14 }
 0x145   : > { %818 = vmatpush3.bf16.msra.mxu1 %v817_v15 }
 0x148   : > { %757 = vmatmul.mubr.msk.f32.vlgmr.msra.gmra.mrb[0].mxu1 %vm486_vm3, %v483_v16 }
 0x21b   : > { %v556_v18 = vpop.f32.mrb[0].mxu1 }
 0x21c   : > { %v557_v19 = vadd.f32 %v556_v18, %v485_v17  ;;  %v758_v20 = vpop.f32.mrb[1].mxu1 }
 0x21e   : > { %560 = vst [vmem:[%s218_s14] sm:$0x1] %v557_v19 }
 0x21f   : > { %877 = shalt.err (!%p874_p3)
}
 0x220   : > { %s878_s6 = scalar_lea.hbm %s1138_s18, 16  ;;  %s882_s9 = scalar_lea.hbm %s1185_s5, 32 }
 0x221   : > { %p879_p4 = scmp.ne.s32.totalorder %s1138_s18, %s878_s6  ;;  %p883_p9 = scmp.lt.u32.totalorder %s1138_s18, %s1185_s5 }
 0x222   : > { %p884_p10 = scmp.lt.u32.totalorder %s882_s9, %s878_s6  ;;  %p886_p12 = scmp.lt.u32.totalorder %s878_s6, %s1138_s18 }
 0x223   : > { %p880_p7 = pnand %p879_p4, %p1001_p5 }
 0x224   : > { %p885_p11 = por %p884_p10, %p883_p9 }
 0x225   : > { %p881_p8 = pneg %p880_p7 }
 0x226   : > { %p887_p13 = por %p886_p12, %p885_p11 }
 0x228   : > { %p888_p0 = pnand %p887_p13, %p881_p8 }
 0x22a   : > { %891 = shalt.err (!%p888_p0)
}
 0x22b   : > { %819 = dma.vmem_to_hbm [thread:$0]  (%p1001_p5), %s1140_s15, 16, %s1138_s18, %s562_s19  }
 0x22c PF: > { %p825_p1 = scmp.ge.s32.totalorder %s926_s23, 2  ;;  %s586_s12 = sand.u32 1, %s914_s20  }
 0x22d   : > { %s587_s13 = scalar_lea.sflag [#allocation4], %s586_s12 }
 0x22e   : > { %p822_p2 = pnand %p825_p1, %p1005_p6 }
 0x230   : > { %909 = dma.done.wait (!%p822_p2), %s587_s13, 16  }
 0x231   : > { %911 = vsyncadd (!%p822_p2), %s587_s13, 4294967280  ;;  %p16_p3 = scmp.ge.s32.totalorder %s989_s25, 4   ;;  %s1190_s20 = smov %s918_s21 }
 0x232   : > { %s1191_s21 = smov %s922_s22  ;;  %s1192_s22 = smov %s999_s28 }
 0x233   : > { %s1193_s23 = smov %s989_s25  ;;  %18 = sbr.rel (!%p16_p3) target bundleno = 5 (0x5), region = 75 }
 0x23a   :  { %591 = vsyncpa [#allocation4], 1 }
 0x23b   :  { %593 = vsyncpa [#allocation4 + $0x1], 1 }

</bundles_post_ra>
